<compile_context>
chip_gen: v7x
topology: tpu7x:2x2x1
jax: 0.10.0
libtpu: 0.0.40
codegen_flags: <defaults>
</compile_context>

<pallas_src>
import functools

import jax
import jax.numpy as jnp
from jax.experimental import pallas as pl
from jax.experimental.pallas import tpu as pltpu


def _round_up(x, m):
    return ((x + m - 1) // m) * m


def swiglu_ffn_kernel(x_ref, w13_ref, b13_ref, w2_ref, b2_ref, o_ref, acc_ref):
    h = pl.program_id(1)
    nh = pl.num_programs(1)

    @pl.when(h == 0)
    def _():
        acc_ref[...] = jnp.zeros_like(acc_ref)

    x = x_ref[...]                                               # (tm, D)

    # Fused fc1|fc3 projection: one MXU push over the fused weight tile.
    h13 = jnp.dot(x, w13_ref[...], preferred_element_type=jnp.float32)
    h13 = h13 + b13_ref[...]                                     # (tm, 2*th)
    th = h13.shape[-1] // 2
    h1 = h13[:, :th]                                             # fc1 slice
    h3 = h13[:, th:]                                             # fc3 slice

    # SwiGLU gate: silu(h1) * h3  (sigmoid -> EUP, muls -> VPU).
    g = (h1 * jax.nn.sigmoid(h1)) * h3                           # (tm, th) f32

    # Partial fc2: accumulate over the H tiles in f32 scratch.
    acc_ref[...] += jnp.dot(g.astype(w2_ref.dtype), w2_ref[...],
                            preferred_element_type=jnp.float32)

    @pl.when(h == nh - 1)
    def _():
        o_ref[...] = (acc_ref[...] + b2_ref[...]).astype(o_ref.dtype)


@functools.partial(jax.jit, static_argnames=("tm", "th"))
def swiglu_ffn(x, w1, b1, w3, b3, w2, b2, *, tm=256, th=512):
    """x: [B, N, D]; w1/w3: [D, H]; w2: [H, D]; b1/b3: [H]; b2: [D].

    Weights are stored (in, out), i.e. already transposed vs. torch.nn.Linear.
    """
    B, N, D = x.shape
    H = w1.shape[1]
    M = B * N

    # ---- token-axis tiling (pad M so every tile is full) -------------------
    tm_eff = _round_up(min(tm, _round_up(M, 8)), 8)
    Mp = _round_up(M, tm_eff)

    # ---- hidden-axis tiling (pad H so every tile is full) ------------------
    if H <= th:
        th_eff = H                      # single H step, block == full dim
    else:
        th_eff = _round_up(th, 128)     # lane-aligned hidden tile
    Hp = _round_up(H, th_eff)
    nh = Hp // th_eff

    x2 = x.reshape(M, D)
    if Mp != M:
        x2 = jnp.pad(x2, ((0, Mp - M), (0, 0)))
    if Hp != H:
        # Zero-padded hidden columns/rows contribute exactly 0 to the output.
        w1 = jnp.pad(w1, ((0, 0), (0, Hp - H)))
        w3 = jnp.pad(w3, ((0, 0), (0, Hp - H)))
        b1 = jnp.pad(b1, ((0, Hp - H),))
        b3 = jnp.pad(b3, ((0, Hp - H),))
        w2 = jnp.pad(w2, ((0, Hp - H), (0, 0)))

    # Fuse W1/W3 tile-interleaved: block h (width 2*th) = [W1 tile h | W3 tile h].
    w13 = jnp.concatenate(
        [w1.reshape(D, nh, 1, th_eff), w3.reshape(D, nh, 1, th_eff)], axis=2
    ).reshape(D, 2 * Hp)
    b13 = jnp.concatenate(
        [b1.reshape(nh, 1, th_eff), b3.reshape(nh, 1, th_eff)], axis=1
    ).reshape(1, 2 * Hp)
    b2_2 = b2.reshape(1, D)

    n_row_tiles = Mp // tm_eff
    itemsize_x = jnp.dtype(x.dtype).itemsize
    itemsize_w = jnp.dtype(w2.dtype).itemsize
    cost = pl.CostEstimate(
        flops=6 * Mp * D * Hp,
        transcendentals=Mp * Hp,
        bytes_accessed=itemsize_x * 2 * Mp * D
        + itemsize_w * n_row_tiles * (w13.size + w2.size),
    )

    out2 = pl.pallas_call(
        swiglu_ffn_kernel,
        out_shape=jax.ShapeDtypeStruct((Mp, D), x.dtype),
        grid_spec=pltpu.PrefetchScalarGridSpec(
            num_scalar_prefetch=0,
            grid=(n_row_tiles, nh),
            in_specs=[
                pl.BlockSpec((tm_eff, D), lambda i, h: (i, 0)),      # x tile
                pl.BlockSpec((D, 2 * th_eff), lambda i, h: (0, h)),  # [W1|W3] tile
                pl.BlockSpec((1, 2 * th_eff), lambda i, h: (0, h)),  # [b1|b3] tile
                pl.BlockSpec((th_eff, D), lambda i, h: (h, 0)),      # W2 tile
                pl.BlockSpec((1, D), lambda i, h: (0, 0)),           # b2
            ],
            out_specs=pl.BlockSpec((tm_eff, D), lambda i, h: (i, 0)),
            scratch_shapes=[pltpu.VMEM((tm_eff, D), jnp.float32)],   # fc2 acc
        ),
        compiler_params=pltpu.CompilerParams(
            dimension_semantics=("parallel", "arbitrary"),
            vmem_limit_bytes=48 * 1024 * 1024,
        ),
        cost_estimate=cost,
    )(x2, w13, b13, w2, b2_2)

    return out2[:M].reshape(B, N, D)


def reference(x, w1, b1, w3, b3, w2, b2):
    h1 = x @ w1 + b1
    h3 = x @ w3 + b3
    return (jax.nn.silu(h1) * h3) @ w2 + b2


if __name__ == "__main__":
    key = jax.random.PRNGKey(0)

    def make(k, B, N, D, H):
        ks = jax.random.split(k, 7)
        x = jax.random.normal(ks[0], (B, N, D), dtype=jnp.float32)
        w1 = jax.random.normal(ks[1], (D, H), dtype=jnp.float32) * 0.05
        b1 = jax.random.normal(ks[2], (H,), dtype=jnp.float32) * 0.05
        w3 = jax.random.normal(ks[3], (D, H), dtype=jnp.float32) * 0.05
        b3 = jax.random.normal(ks[4], (H,), dtype=jnp.float32) * 0.05
        w2 = jax.random.normal(ks[5], (H, D), dtype=jnp.float32) * 0.05
        b2 = jax.random.normal(ks[6], (D,), dtype=jnp.float32) * 0.05
        return x, w1, b1, w3, b3, w2, b2

    k1, k2 = jax.random.split(key)

    # Test 1: toy shapes (batch=2, seq=8, in=32, hidden=64) -> single grid step.
    args = make(k1, 2, 8, 32, 64)
    out = jax.block_until_ready(swiglu_ffn(*args))
    ref = reference(*args)
    assert out.shape == (2, 8, 32)
    assert jnp.allclose(out, ref, atol=1e-5, rtol=1e-5), "mismatch (test 1)"

    # Test 2: exercises token-tile padding and the H-tiled reduction axis.
    args2 = make(k2, 2, 24, 128, 320)
    out2 = jax.block_until_ready(swiglu_ffn(*args2, tm=32, th=128))
    ref2 = reference(*args2)
    assert out2.shape == (2, 24, 128)
    assert jnp.allclose(out2, ref2, atol=1e-4, rtol=1e-4), "mismatch (test 2)"

    print("KERNEL_OK")
</pallas_src>

<mosaic_0001>
module attributes {stable_mosaic.version = 11 : i64} {
  func.func @swiglu_ffn_kernel(%arg0: i32, %arg1: i32, %arg2: memref<16x32xf32, #tpu.memory_space<vmem>>, %arg3: memref<32x128xf32, #tpu.memory_space<vmem>>, %arg4: memref<1x128xf32, #tpu.memory_space<vmem>>, %arg5: memref<64x32xf32, #tpu.memory_space<vmem>>, %arg6: memref<1x32xf32, #tpu.memory_space<vmem>>, %arg7: memref<16x32xf32, #tpu.memory_space<vmem>>, %arg8: memref<16x32xf32, #tpu.memory_space<vmem>>) attributes {dimension_semantics = [#tpu.dimension_semantics<parallel>, #tpu.dimension_semantics<arbitrary>], iteration_bounds = array<i64: 1, 1>, scalar_prefetch = 0 : i64, scratch_operands = 1 : i64, tpu.core_type = #tpu.core_type<tc>, window_params = [{transform_indices = @transform_0, window_bounds = array<i64: 16, 32>}, {transform_indices = @transform_1, window_bounds = array<i64: 32, 128>}, {transform_indices = @transform_2, window_bounds = array<i64: 1, 128>}, {transform_indices = @transform_3, window_bounds = array<i64: 64, 32>}, {pipeline_mode = #tpu.pipeline_mode<synchronous>, transform_indices = @transform_4, window_bounds = array<i64: 1, 32>}, {transform_indices = @transform_5, window_bounds = array<i64: 16, 32>}]} {
    %c0_i32 = arith.constant 0 : i32
    %0 = arith.cmpi eq, %arg1, %c0_i32 : i32
    %1 = arith.extui %0 : i1 to i32
    %c0_i32_0 = arith.constant 0 : i32
    %2 = arith.cmpi ne, %1, %c0_i32_0 : i32
    scf.if %2 {
      %cst_16 = arith.constant 0.000000e+00 : f32
      %26 = vector.broadcast %cst_16 : f32 to vector<16x32xf32>
      %c0_17 = arith.constant 0 : index
      %c0_18 = arith.constant 0 : index
      %27 = vector.load %arg8[%c0_17, %c0_18] : memref<16x32xf32, #tpu.memory_space<vmem>>, vector<16x32xf32>
      tpu.vector_store %arg8[%c0_17, %c0_18], %26 {strides = array<i32>} : memref<16x32xf32, #tpu.memory_space<vmem>>, vector<16x32xf32>,
    } else {
    }
    %c0 = arith.constant 0 : index
    %c0_1 = arith.constant 0 : index
    %3 = vector.load %arg2[%c0, %c0_1] : memref<16x32xf32, #tpu.memory_space<vmem>>, vector<16x32xf32>
    %c0_2 = arith.constant 0 : index
    %c0_3 = arith.constant 0 : index
    %4 = vector.load %arg3[%c0_2, %c0_3] : memref<32x128xf32, #tpu.memory_space<vmem>>, vector<32x128xf32>
    %cst = arith.constant dense<0.000000e+00> : vector<16x128xf32>
    %5 = tpu.matmul %3, %4, %cst {dimension_numbers = #tpu.dot_dimension_numbers<[1], [0], [0], [1], [0, 0, 1, 1], [], []>} : vector<16x32xf32>, vector<32x128xf32>, vector<16x128xf32> -> vector<16x128xf32>
    %c0_4 = arith.constant 0 : index
    %c0_5 = arith.constant 0 : index
    %6 = vector.load %arg4[%c0_4, %c0_5] : memref<1x128xf32, #tpu.memory_space<vmem>>, vector<1x128xf32>
    %7 = vector.broadcast %6 : vector<1x128xf32> to vector<16x128xf32>
    %8 = arith.addf %5, %7 : vector<16x128xf32>
    %9 = vector.extract_strided_slice %8 {offsets = [0, 0], sizes = [16, 64], strides = [1, 1]} : vector<16x128xf32> to vector<16x64xf32>
    %10 = vector.extract_strided_slice %8 {offsets = [0, 64], sizes = [16, 64], strides = [1, 1]} : vector<16x128xf32> to vector<16x64xf32>
    %11 = arith.negf %9 : vector<16x64xf32>
    %12 = math.exp %11 : vector<16x64xf32>
    %cst_6 = arith.constant 1.000000e+00 : f32
    %13 = vector.broadcast %cst_6 : f32 to vector<16x64xf32>
    %14 = arith.addf %13, %12 : vector<16x64xf32>
    %15 = arith.divf %13, %14 : vector<16x64xf32>
    %16 = arith.mulf %9, %15 : vector<16x64xf32>
    %17 = arith.mulf %16, %10 : vector<16x64xf32>
    %c0_7 = arith.constant 0 : index
    %c0_8 = arith.constant 0 : index
    %18 = vector.load %arg8[%c0_7, %c0_8] : memref<16x32xf32, #tpu.memory_space<vmem>>, vector<16x32xf32>
    %c0_9 = arith.constant 0 : index
    %c0_10 = arith.constant 0 : index
    %19 = vector.load %arg5[%c0_9, %c0_10] : memref<64x32xf32, #tpu.memory_space<vmem>>, vector<64x32xf32>
    %cst_11 = arith.constant dense<0.000000e+00> : vector<16x32xf32>
    %20 = tpu.matmul %17, %19, %cst_11 {dimension_numbers = #tpu.dot_dimension_numbers<[1], [0], [0], [1], [0, 0, 1, 1], [], []>} : vector<16x64xf32>, vector<64x32xf32>, vector<16x32xf32> -> vector<16x32xf32>
    %21 = arith.addf %18, %20 : vector<16x32xf32>
    %c0_12 = arith.constant 0 : index
    %c0_13 = arith.constant 0 : index
    %22 = vector.load %arg8[%c0_12, %c0_13] : memref<16x32xf32, #tpu.memory_space<vmem>>, vector<16x32xf32>
    tpu.vector_store %arg8[%c0_12, %c0_13], %21 {strides = array<i32>} : memref<16x32xf32, #tpu.memory_space<vmem>>, vector<16x32xf32>,
    %c0_i32_14 = arith.constant 0 : i32
    %23 = arith.cmpi eq, %arg1, %c0_i32_14 : i32
    %24 = arith.extui %23 : i1 to i32
    %c0_i32_15 = arith.constant 0 : i32
    %25 = arith.cmpi ne, %24, %c0_i32_15 : i32
    scf.if %25 {
      %c0_16 = arith.constant 0 : index
      %c0_17 = arith.constant 0 : index
      %26 = vector.load %arg8[%c0_16, %c0_17] : memref<16x32xf32, #tpu.memory_space<vmem>>, vector<16x32xf32>
      %c0_18 = arith.constant 0 : index
      %c0_19 = arith.constant 0 : index
      %27 = vector.load %arg6[%c0_18, %c0_19] : memref<1x32xf32, #tpu.memory_space<vmem>>, vector<1x32xf32>
      %28 = vector.broadcast %27 : vector<1x32xf32> to vector<16x32xf32>
      %29 = arith.addf %26, %28 : vector<16x32xf32>
      %c0_20 = arith.constant 0 : index
      %c0_21 = arith.constant 0 : index
      %30 = vector.load %arg7[%c0_20, %c0_21] : memref<16x32xf32, #tpu.memory_space<vmem>>, vector<16x32xf32>
      tpu.vector_store %arg7[%c0_20, %c0_21], %29 {strides = array<i32>} : memref<16x32xf32, #tpu.memory_space<vmem>>, vector<16x32xf32>,
    } else {
    }
    return
  }
  func.func @transform_0(%arg0: i32, %arg1: i32) -> (i32, i32) {
    %c0_i32 = arith.constant 0 : i32
    %c0_i32_0 = arith.constant 0 : i32
    return %arg0, %c0_i32 : i32, i32
  }
  func.func @transform_1(%arg0: i32, %arg1: i32) -> (i32, i32) {
    %c0_i32 = arith.constant 0 : i32
    %c0_i32_0 = arith.constant 0 : i32
    return %c0_i32, %arg1 : i32, i32
  }
  func.func @transform_2(%arg0: i32, %arg1: i32) -> (i32, i32) {
    %c0_i32 = arith.constant 0 : i32
    %c0_i32_0 = arith.constant 0 : i32
    return %c0_i32, %arg1 : i32, i32
  }
  func.func @transform_3(%arg0: i32, %arg1: i32) -> (i32, i32) {
    %c0_i32 = arith.constant 0 : i32
    %c0_i32_0 = arith.constant 0 : i32
    return %arg1, %c0_i32 : i32, i32
  }
  func.func @transform_4(%arg0: i32, %arg1: i32) -> (i32, i32) {
    %c0_i32 = arith.constant 0 : i32
    %c0_i32_0 = arith.constant 0 : i32
    %c0_i32_1 = arith.constant 0 : i32
    return %c0_i32, %c0_i32_0 : i32, i32
  }
  func.func @transform_5(%arg0: i32, %arg1: i32) -> (i32, i32) {
    %c0_i32 = arith.constant 0 : i32
    %c0_i32_0 = arith.constant 0 : i32
    return %arg0, %c0_i32 : i32, i32
  }
}

</mosaic_0001>

<bundles_post_ra>
// kernel: swiglu_ffn.1
= control target key start
LH: loop header
LB: loop body
LE: loop exit
PB: predicated region body
PF: predicated region fallthrough
CT: control target
= control target key end

     0   :  { %vm25_vm0 = vcmask 261120   ;;  %s493_s0 = inlined_call_operand.vmem [shape: f32[16,32], index: 0, kind: input, shape index: {}]   ;;  %s494_s1 = inlined_call_operand.vmem [shape: f32[32,128], index: 1, kind: input, shape index: {}]   ;;  %s495_s2 = inlined_call_operand.vmem [shape: f32[1,128], index: 2, kind: input, shape index: {}]   ;;  %s496_s3 = inlined_call_operand.vmem [shape: f32[64,32], index: 3, kind: input, shape index: {}]   ;;  %s497_s4 = inlined_call_operand.vmem [shape: f32[1,32], index: 4, kind: input, shape index: {}]   ;;  %s498_s5 = inlined_call_operand.hbm [shape: f32[16,32], index: 5, kind: output, shape index: {}]  }
   0x1   :  { %v30_v0 = vld [vmem:[%s494_s1] sm:$0xff]  ;;  %v31_v1 = vld [vmem:[%s494_s1 + $0x8] sm:$0xff]  ;;  %v32_v2 = vld [vmem:[%s494_s1 + $0x10] sm:$0xff] }
   0x2   :  { %v329_v3 = vpack.c.bf16 %v31_v1, %v30_v0  ;;  %v33_v4 = vld [vmem:[%s494_s1 + $0x18] sm:$0xff]  ;;  %v28_v5 = vld [vmem:[%s493_s0] sm:$0xff] }
   0x3   :  { %v333_v6 = vpack.c.bf16 %v33_v4, %v32_v2  ;;  %307 = vmatprep.mubr.msk.f32.mxu0 %vm25_vm0, %v28_v5 }
   0x4   :  { %10 = vsyncpa [#allocation4], 0  ;;  %330 = vmatprep.subr.bf16.mxu0 %v329_v3  ;;  %v29_v7 = vld [vmem:[%s493_s0 + $0x8] sm:$0xff]  ;;  %v149_v8 = vld [vmem:[%s496_s3] sm:$0xff]  ;;  %v390_v20 = vmov 0.0   ;;  %s391_s21 = smov 64  }
   0x5   :  { %332 = vmatpush3.bf16.msra.mxu0 %v329_v3  ;;  %v150_v9 = vld [vmem:[%s496_s3 + $0x8] sm:$0xff]  ;;  %v151_v10 = vld [vmem:[%s496_s3 + $0x10] sm:$0xff]  ;;  %v152_v12 = vld [vmem:[%s496_s3 + $0x18] sm:$0xff]  ;;  %27 = vst.msk [vmem:[#allocation2 + $0x8] sm:$0xff] %vm25_vm0, %v390_v20  ;;  %vm157_vm1 = vcmask 523264   ;;  %s392_s22 = smov [#allocation3]  }
   0x6   :  { %334 = vmatprep.subr.bf16.mxu0 %v333_v6  ;;  %v337_v11 = vpack.c.bf16 %v150_v9, %v149_v8  ;;  %v341_v13 = vpack.c.bf16 %v152_v12, %v151_v10  ;;  %v153_v14 = vld [vmem:[%s496_s3 + $0x20] sm:$0xff]  ;;  %v154_v15 = vld [vmem:[%s496_s3 + $0x28] sm:$0xff]  ;;  %v155_v17 = vld [vmem:[%s496_s3 + $0x30] sm:$0xff]  ;;  %26 = vst.msk [vmem:[#allocation2] sm:$0xff] %vm25_vm0, %v390_v20  ;;  %s264_s23 = sshll.u32 %s392_s22, 4  ;;  %s265_s23 = int_to_ptr.vmem [resolvable:$true] %s264_s23 }
   0x7   :  { %v345_v16 = vpack.c.bf16 %v154_v15, %v153_v14  ;;  %v156_v18 = vld [vmem:[%s496_s3 + $0x38] sm:$0xff]  ;;  %v275_v21 = vld [vmem:[%s495_s2] ss:$0 sm:$0xff]  ;;  %s366_s24 = scalar_lea.vmem %s265_s23, 256  ;;  %p371_p1 = scmp.lt.s32.totalorder %s265_s23, %s265_s23 }
   0x8   :  { %338 = vmatprep.subr.bf16.mxu1 %v337_v11  ;;  %v349_v19 = vpack.c.bf16 %v156_v18, %v155_v17  ;;  %v282_v46 = vld [vmem:[%s497_s4] ss:$0 sm:$0xff]  ;;  %p367_p0 = scmp.ne.s32.totalorder %s265_s23, %s366_s24  ;;  %p372_p2 = scmp.lt.s32.totalorder %s366_s24, %s366_s24 }
   0x9   :  { %336 = vmatpush3.bf16.msra.mxu0 %v333_v6  ;;  %340 = vmatpush3.bf16.msra.mxu1 %v337_v11 }
   0xa   :  { %342 = vmatprep.subr.bf16.mxu1 %v341_v13  ;;  %p373_p3 = por %p372_p2, %p371_p1 }
   0xc   :  { %308 = vmatmul.mubr.msk.f32.vlgmr.msra.gmra.mrb[0].mxu0 %vm25_vm0, %v29_v7  ;;  %v148_v40 = vld [vmem:[#allocation2 + $0x8] sm:$0xff]  ;;  %p374_p4 = pnand %p373_p3, %p367_p0 }
   0xd   :  { %344 = vmatpush3.bf16.msra.mxu1 %v341_v13  ;;  %v147_v41 = vld [vmem:[#allocation2] sm:$0xff] }
   0xe   :  { %346 = vmatprep.subr.bf16.mxu1 %v345_v16 }
  0x11   :  { %348 = vmatpush3.bf16.msra.mxu1 %v345_v16 }
  0x12   :  { %350 = vmatprep.subr.bf16.mxu1 %v349_v19 }
  0x15   :  { %352 = vmatpush3.bf16.msra.mxu1 %v349_v19 }
  0xdf   :  { %v309_v22 = vpop.f32.mrb[0].mxu0 }
  0xe0   :  { %v114_v23 = vpop.f32.mrb[1].mxu0  ;;  %v120_v25 = vadd.f32 %v309_v22, %v275_v21 }
  0xe1   :  { %v115_v24 = vadd.f32 %v275_v21, %v114_v23 }
  0xe2   :  { %v279_v27 = vmul.f32 -1.442695, %v120_v25 }
  0xe3   :  { %139 = vrot.lane.b32.xlu0 %v115_v24, %s391_s21  ;;  %v278_v26 = vmul.f32 -1.442695, %v115_v24 }
  0xe5   :  { %358 = vpow2.f32 %v278_v26 }
  0xe6   :  { %360 = vpow2.f32 %v279_v27 }
  0xe7   :  { %141 = vrot.lane.b32.xlu0 %v120_v25, %s391_s21 }
  0xef   :  { %v359_v28 = vpop.eup %358 }
  0xf0   :  { %v129_v29 = vadd.f32 1.0, %v359_v28  ;;  %v361_v30 = vpop.eup %360 }
  0xf1   :  { %v130_v31 = vadd.f32 1.0, %v361_v30 }
  0xf2   :  { %362 = vrcp.f32 %v129_v29 }
  0xf3   :  { %364 = vrcp.f32 %v130_v31 }
  0xfc   :  { %v363_v32 = vpop.eup %362 }
  0xfd   :  { %v135_v33 = vmul.f32 %v363_v32, %v115_v24  ;;  %v365_v34 = vpop.eup %364 }
  0xfe   :  { %v136_v37 = vmul.f32 %v365_v34, %v120_v25 }
 0x155   :  { %v140_v35 = vpop.permute.xlu0 %139 }
 0x156   :  { %v145_v36 = vmul.f32 %v140_v35, %v135_v33 }
 0x158   :  { %326 = vmatprep.mubr.msk.f32.mxu1 %vm157_vm1, %v145_v36 }
 0x159   :  { %v142_v38 = vpop.permute.xlu0 %141 }
 0x15a   :  { %v146_v39 = vmul.f32 %v142_v38, %v136_v37 }
 0x15c   :  { %327 = vmatmul.mubr.msk.f32.vlgmr.msra.gmra.mrb[0].mxu1 %vm157_vm1, %v146_v39 }
 0x22f   :  { %v328_v42 = vpop.f32.mrb[0].mxu1 }
 0x230   :  { %v240_v43 = vadd.f32 %v328_v42, %v148_v40  ;;  %v230_v44 = vpop.f32.mrb[1].mxu1 }
 0x231   :  { %v239_v45 = vadd.f32 %v230_v44, %v147_v41 }
 0x232   :  { %242 = vst.msk [vmem:[#allocation2 + $0x8] sm:$0xff] %vm25_vm0, %v240_v43 }
 0x233   :  { %241 = vst.msk [vmem:[#allocation2] sm:$0xff] %vm25_vm0, %v239_v45 }
 0x239   :  { %v247_v47 = vld [vmem:[#allocation2 + $0x8] sm:$0xff] }
 0x23a   :  { %v246_v48 = vld [vmem:[#allocation2] sm:$0xff]  ;;  %v256_v49 = vadd.f32 %v282_v46, %v247_v47 }
 0x23b   :  { %v255_v50 = vadd.f32 %v282_v46, %v246_v48 }
 0x23c   :  { %258 = vst.msk [vmem:[#allocation3 + $0x8] sm:$0xff] %vm25_vm0, %v256_v49 }
 0x23d   :  { %257 = vst.msk [vmem:[#allocation3] sm:$0xff] %vm25_vm0, %v255_v50 }
 0x23e   :  { %377 = shalt.err (!%p374_p4)
}
 0x23f   :  { %s378_s26 = scalar_lea.hbm %s498_s5, 256 }
 0x240   :  { %p379_p5 = scmp.ne.s32.totalorder %s498_s5, %s378_s26  ;;  %p382_p6 = scmp.lt.u32.totalorder %s378_s26, %s498_s5 }
 0x242   :  { %p384_p7 = pnand %p382_p6, %p379_p5 }
 0x244   :  { %387 = shalt.err (!%p384_p7)
}
 0x245   :  { %s393_s1 = smov 128   ;;  %s394_s6 = smov 8  }
 0x246   :  { %270 = dma.vmem_to_hbm [thread:$0]  %s265_s23, 256, %s498_s5, [#allocation4], %s393_s1, %s393_s1, %s394_s6  }
 0x247   :  { %388 = dma.done.wait [#allocation4], 256  }
 0x248   :  { %389 = vsyncadd [#allocation4], 4294967040 }
 0x249   :  { %274 = vsyncpa [#allocation4], 1 }

</bundles_post_ra>
